<compile_context>
chip_gen: v7x
topology: tpu7x:2x2x1
jax: 0.10.0
libtpu: 0.0.40
codegen_flags: <defaults>
</compile_context>

<pallas_src>
import functools

import jax
import jax.numpy as jnp
from jax.experimental import pallas as pl
from jax.experimental.pallas import tpu as pltpu


# ----------------------------- Fused Pallas kernel --------------------------

def _fused_probe_kernel(p_ref, wp_ref, bp_ref, wc_ref, bc_ref, o_ref, acc_ref,
                        *, inv_n, tb, tn):
    """Grid = (B_pad // TB, N_pad // TN).

    Per step: patch-embed a [TB*TN, K] block (bf16 operands, f32 MXU acc) and
    accumulate the per-batch token sum into a (TB, D) VMEM scratch.
    Last reduction step: mean = sum * (1/N) + hoisted bias, then the bf16
    classifier matmul (+ f32 bias) writes the (TB, NC_pad) logits block.
    """
    n_idx = pl.program_id(1)

    @pl.when(n_idx == 0)
    def _init():
        acc_ref[...] = jnp.zeros_like(acc_ref)

    # patch-embed: [TB*TN, K] @ [K, D]  (bf16 in, f32 accumulate on the MXU)
    pflat = p_ref[...].reshape(tb * tn, -1)
    tokens = jnp.dot(pflat, wp_ref[...], preferred_element_type=jnp.float32)
    # no_grad in torch -> forward-only here; tokens never leave the kernel.
    # Bias is hoisted to finalize, so zero-padded token rows add exactly 0.
    acc_ref[...] += tokens.reshape(tb, tn, -1).sum(axis=1)

    @pl.when(n_idx == pl.num_programs(1) - 1)
    def _finalize():
        # mean over the TRUE token count + hoisted patch-embed bias (f32).
        pooled = acc_ref[...] * inv_n + bp_ref[...]                 # (TB, D)
        logits = jnp.dot(pooled.astype(jnp.bfloat16), wc_ref[...],
                         preferred_element_type=jnp.float32)
        o_ref[0] = (logits + bc_ref[...]).astype(o_ref.dtype)


# ----------------------------- Tiling helpers --------------------------------

def _choose_tn(n):
    """Token tile.  N is zero-padded up to a multiple of the returned tile."""
    for cand in (512, 256):
        if n >= cand:
            return cand
    # Small N: a single sublane-aligned tile covering all (padded) tokens.
    return max(8, ((n + 7) // 8) * 8)


def _choose_tb(b):
    """Batch block.  Keep >= 2 grid steps on the parallel batch axis so both
    v7x TensorCores get work; within that, make blocks as large as possible."""
    if b >= 16:
        return 8
    if b >= 8:
        return 4
    if b >= 4:
        return 2
    return 1


def _vmem_budget(tb, tn, k, d, nc_pad):
    bytes_needed = (
        2 * tb * tn * k * 2        # double-buffered bf16 patch block
        + 2 * k * d * 2            # bf16 patch-embed weight (resident)
        + 2 * d * 4                # f32 patch-embed bias
        + 2 * d * nc_pad * 2       # bf16 classifier weight (resident)
        + 2 * nc_pad * 4           # f32 classifier bias
        + 2 * tb * nc_pad * 4      # double-buffered f32 logits block
        + tb * d * 4               # f32 per-batch-block accumulator scratch
    )
    # +4 MiB compiler-internal headroom; cap at 48 MiB (< v7x 64 MiB physical).
    return int(min(max(bytes_needed + (4 << 20), 16 << 20), 48 << 20))


# ----------------------------- Wrapper ---------------------------------------

def linear_probe_model(x, params, patch_size, num_classes):
    """Forward pass of LinearProbeModel.

    x: [B, C, H, W] (NCHW, like PyTorch).  Returns logits [B, num_classes].
    """
    B, C, H, W = x.shape
    P = patch_size
    nh, nw = H // P, W // P
    N = nh * nw
    K = C * P * P
    D = params["w_patch"].shape[1]

    # --- glue: cast to bf16 FIRST (halves the materialized transpose), then
    #     extract non-overlapping patches flattened in (C, P, P) order -------
    x_bf = x.astype(jnp.bfloat16)
    patches = x_bf.reshape(B, C, nh, P, nw, P)
    patches = patches.transpose(0, 2, 4, 1, 3, 5)       # [B, nh, nw, C, P, P]
    patches = patches.reshape(B, N, K)

    # --- tiling / zero-padding of the batch and token axes ------------------
    TN = _choose_tn(N)
    TB = _choose_tb(B)
    N_pad = ((N + TN - 1) // TN) * TN
    B_pad = ((B + TB - 1) // TB) * TB
    nb_blocks = B_pad // TB
    nn_blocks = N_pad // TN
    if (B_pad, N_pad) != (B, N):
        patches = jnp.pad(patches, ((0, B_pad - B), (0, N_pad - N), (0, 0)))

    w_patch = params["w_patch"].astype(jnp.bfloat16)    # [K, D]
    b_patch = params["b_patch"].astype(jnp.float32)     # [1, D]

    # --- classifier: bf16 weight padded to a lane-dense (128-wide) slab -----
    nc_pad = max(128, ((num_classes + 127) // 128) * 128)
    w_cls = jnp.zeros((D, nc_pad), jnp.bfloat16).at[:, :num_classes].set(
        params["w_cls"].astype(jnp.bfloat16))
    b_cls = jnp.zeros((1, nc_pad), jnp.float32).at[:, :num_classes].set(
        params["b_cls"].astype(jnp.float32))

    cost = pl.CostEstimate(
        flops=2 * B_pad * N_pad * K * D + 2 * B_pad * D * nc_pad,
        transcendentals=0,
        bytes_accessed=(B_pad * N_pad * K * 2 + K * D * 2 + D * 4
                        + D * nc_pad * 2 + nc_pad * 4 + B_pad * nc_pad * 4),
    )

    kernel = functools.partial(_fused_probe_kernel,
                               inv_n=1.0 / float(N), tb=TB, tn=TN)

    logits_pad = pl.pallas_call(
        kernel,
        out_shape=jax.ShapeDtypeStruct((nb_blocks, TB, nc_pad), jnp.float32),
        grid_spec=pltpu.PrefetchScalarGridSpec(
            num_scalar_prefetch=0,
            grid=(nb_blocks, nn_blocks),
            in_specs=[
                pl.BlockSpec((TB, TN, K), lambda b, n: (b, n, 0)),  # patches
                pl.BlockSpec((K, D), lambda b, n: (0, 0)),          # w_patch
                pl.BlockSpec((1, D), lambda b, n: (0, 0)),          # b_patch
                pl.BlockSpec((D, nc_pad), lambda b, n: (0, 0)),     # w_cls
                pl.BlockSpec((1, nc_pad), lambda b, n: (0, 0)),     # b_cls
            ],
            out_specs=pl.BlockSpec((1, TB, nc_pad), lambda b, n: (b, 0, 0)),
            scratch_shapes=[pltpu.VMEM((TB, D), jnp.float32)],
        ),
        compiler_params=pltpu.CompilerParams(
            dimension_semantics=("parallel", "arbitrary"),
            vmem_limit_bytes=_vmem_budget(TB, TN, K, D, nc_pad),
        ),
        cost_estimate=cost,
    )(patches, w_patch, b_patch, w_cls, b_cls)

    logits_pad = logits_pad.reshape(B_pad, nc_pad)
    return logits_pad[:B, :num_classes]


# ----------------------------- Parameter init --------------------------------

def init_params(key, in_features_patch, embed_dim, num_classes):
    k1, k2, k3, k4 = jax.random.split(key, 4)
    # nn.Linear-style uniform(-1/sqrt(fan_in), 1/sqrt(fan_in)) init.
    s_patch = 1.0 / (in_features_patch ** 0.5)
    s_cls = 1.0 / (embed_dim ** 0.5)
    return {
        "w_patch": jax.random.uniform(k1, (in_features_patch, embed_dim),
                                      jnp.float32, -s_patch, s_patch),
        "b_patch": jax.random.uniform(k2, (1, embed_dim),
                                      jnp.float32, -s_patch, s_patch),
        "w_cls": jax.random.uniform(k3, (embed_dim, num_classes),
                                    jnp.float32, -s_cls, s_cls),
        "b_cls": jax.random.uniform(k4, (1, num_classes),
                                    jnp.float32, -s_cls, s_cls),
    }


# ----------------------------- Main -------------------------------------------

if __name__ == "__main__":
    B, C, H, W = 2, 4, 16, 16
    PATCH = 8
    EMBED_DIM = 32
    NUM_CLASSES = 10

    key = jax.random.PRNGKey(0)
    kx, kp = jax.random.split(key)

    x = jax.random.normal(kx, (B, C, H, W), jnp.float32)
    params = init_params(kp, C * PATCH * PATCH, EMBED_DIM, NUM_CLASSES)

    logits = linear_probe_model(x, params, PATCH, NUM_CLASSES)
    jax.block_until_ready(logits)

    # Pure-JAX reference mirroring the kernel's dtype decisions
    # (bf16-rounded matmul operands, f32 accumulation, bias hoisted to mean).
    nh, nw = H // PATCH, W // PATCH
    N = nh * nw
    patches_ref = x.reshape(B, C, nh, PATCH, nw, PATCH)
    patches_ref = patches_ref.transpose(0, 2, 4, 1, 3, 5).reshape(B, N, -1)
    p_bf = patches_ref.astype(jnp.bfloat16).astype(jnp.float32)
    w_bf = params["w_patch"].astype(jnp.bfloat16).astype(jnp.float32)
    tokens_ref = jnp.matmul(p_bf, w_bf)                          # [B, N, D]
    pooled_ref = tokens_ref.mean(axis=1) + params["b_patch"]     # [B, D]
    pooled_bf = pooled_ref.astype(jnp.bfloat16).astype(jnp.float32)
    wc_bf = params["w_cls"].astype(jnp.bfloat16).astype(jnp.float32)
    logits_ref = pooled_bf @ wc_bf + params["b_cls"]

    assert logits.shape == (B, NUM_CLASSES)
    assert jnp.allclose(logits, logits_ref, atol=2e-3, rtol=2e-3), (
        jnp.max(jnp.abs(logits - logits_ref)))

    print("KERNEL_OK")
</pallas_src>

<mosaic_0001>
module attributes {stable_mosaic.version = 11 : i64} {
  func.func @_fused_probe_kernel(%arg0: i32, %arg1: i32, %arg2: memref<1x8x256xbf16, #tpu.memory_space<vmem>>, %arg3: memref<256x32xbf16, #tpu.memory_space<vmem>>, %arg4: memref<1x32xf32, #tpu.memory_space<vmem>>, %arg5: memref<32x128xbf16, #tpu.memory_space<vmem>>, %arg6: memref<1x128xf32, #tpu.memory_space<vmem>>, %arg7: memref<1x1x128xf32, #tpu.memory_space<vmem>>, %arg8: memref<1x32xf32, #tpu.memory_space<vmem>>) attributes {dimension_semantics = [#tpu.dimension_semantics<parallel>, #tpu.dimension_semantics<arbitrary>], iteration_bounds = array<i64: 2, 1>, scalar_prefetch = 0 : i64, scratch_operands = 1 : i64, tpu.core_type = #tpu.core_type<tc>, window_params = [{transform_indices = @transform_0, window_bounds = array<i64: 1, 8, 256>}, {pipeline_mode = #tpu.pipeline_mode<synchronous>, transform_indices = @transform_1, window_bounds = array<i64: 256, 32>}, {pipeline_mode = #tpu.pipeline_mode<synchronous>, transform_indices = @transform_2, window_bounds = array<i64: 1, 32>}, {pipeline_mode = #tpu.pipeline_mode<synchronous>, transform_indices = @transform_3, window_bounds = array<i64: 32, 128>}, {pipeline_mode = #tpu.pipeline_mode<synchronous>, transform_indices = @transform_4, window_bounds = array<i64: 1, 128>}, {transform_indices = @transform_5, window_bounds = array<i64: 1, 1, 128>}]} {
    %c0_i32 = arith.constant 0 : i32
    %0 = arith.cmpi eq, %arg1, %c0_i32 : i32
    %1 = arith.extui %0 : i1 to i32
    %c0_i32_0 = arith.constant 0 : i32
    %2 = arith.cmpi ne, %1, %c0_i32_0 : i32
    scf.if %2 {
      %cst_12 = arith.constant 0.000000e+00 : f32
      %15 = vector.broadcast %cst_12 : f32 to vector<1x32xf32>
      %c0_13 = arith.constant 0 : index
      %c0_14 = arith.constant 0 : index
      %16 = vector.load %arg8[%c0_13, %c0_14] : memref<1x32xf32, #tpu.memory_space<vmem>>, vector<1x32xf32>
      tpu.vector_store %arg8[%c0_13, %c0_14], %15 {strides = array<i32>} : memref<1x32xf32, #tpu.memory_space<vmem>>, vector<1x32xf32>,
    } else {
    }
    %c0 = arith.constant 0 : index
    %c0_1 = arith.constant 0 : index
    %c0_2 = arith.constant 0 : index
    %3 = vector.load %arg2[%c0, %c0_1, %c0_2] : memref<1x8x256xbf16, #tpu.memory_space<vmem>>, vector<1x8x256xbf16>
    %4 = vector.shape_cast %3 : vector<1x8x256xbf16> to vector<8x256xbf16>
    %c0_3 = arith.constant 0 : index
    %c0_4 = arith.constant 0 : index
    %5 = vector.load %arg3[%c0_3, %c0_4] : memref<256x32xbf16, #tpu.memory_space<vmem>>, vector<256x32xbf16>
    %cst = arith.constant dense<0.000000e+00> : vector<8x32xf32>
    %6 = tpu.matmul %4, %5, %cst {dimension_numbers = #tpu.dot_dimension_numbers<[1], [0], [0], [1], [0, 0, 1, 1], [], []>} : vector<8x256xbf16>, vector<256x32xbf16>, vector<8x32xf32> -> vector<8x32xf32>
    %c0_5 = arith.constant 0 : index
    %c0_6 = arith.constant 0 : index
    %7 = vector.load %arg8[%c0_5, %c0_6] : memref<1x32xf32, #tpu.memory_space<vmem>>, vector<1x32xf32>
    %8 = vector.shape_cast %6 : vector<8x32xf32> to vector<1x8x32xf32>
    %cst_7 = arith.constant dense<0.000000e+00> : vector<1x32xf32>
    %9 = vector.multi_reduction <add>, %8, %cst_7 [1] : vector<1x8x32xf32> to vector<1x32xf32>
    %10 = arith.addf %7, %9 : vector<1x32xf32>
    %c0_8 = arith.constant 0 : index
    %c0_9 = arith.constant 0 : index
    %11 = vector.load %arg8[%c0_8, %c0_9] : memref<1x32xf32, #tpu.memory_space<vmem>>, vector<1x32xf32>
    tpu.vector_store %arg8[%c0_8, %c0_9], %10 {strides = array<i32>} : memref<1x32xf32, #tpu.memory_space<vmem>>, vector<1x32xf32>,
    %c0_i32_10 = arith.constant 0 : i32
    %12 = arith.cmpi eq, %arg1, %c0_i32_10 : i32
    %13 = arith.extui %12 : i1 to i32
    %c0_i32_11 = arith.constant 0 : i32
    %14 = arith.cmpi ne, %13, %c0_i32_11 : i32
    scf.if %14 {
      %c0_12 = arith.constant 0 : index
      %c0_13 = arith.constant 0 : index
      %15 = vector.load %arg8[%c0_12, %c0_13] : memref<1x32xf32, #tpu.memory_space<vmem>>, vector<1x32xf32>
      %cst_14 = arith.constant 2.500000e-01 : f32
      %16 = vector.broadcast %cst_14 : f32 to vector<1x32xf32>
      %17 = arith.mulf %15, %16 : vector<1x32xf32>
      %c0_15 = arith.constant 0 : index
      %c0_16 = arith.constant 0 : index
      %18 = vector.load %arg4[%c0_15, %c0_16] : memref<1x32xf32, #tpu.memory_space<vmem>>, vector<1x32xf32>
      %19 = arith.addf %17, %18 : vector<1x32xf32>
      %20 = arith.truncf %19 : vector<1x32xf32> to vector<1x32xbf16>
      %c0_17 = arith.constant 0 : index
      %c0_18 = arith.constant 0 : index
      %21 = vector.load %arg5[%c0_17, %c0_18] : memref<32x128xbf16, #tpu.memory_space<vmem>>, vector<32x128xbf16>
      %cst_19 = arith.constant dense<0.000000e+00> : vector<1x128xf32>
      %22 = tpu.matmul %20, %21, %cst_19 {dimension_numbers = #tpu.dot_dimension_numbers<[1], [0], [0], [1], [0, 0, 1, 1], [], []>} : vector<1x32xbf16>, vector<32x128xbf16>, vector<1x128xf32> -> vector<1x128xf32>
      %c0_20 = arith.constant 0 : index
      %c0_21 = arith.constant 0 : index
      %23 = vector.load %arg6[%c0_20, %c0_21] : memref<1x128xf32, #tpu.memory_space<vmem>>, vector<1x128xf32>
      %24 = arith.addf %22, %23 : vector<1x128xf32>
      %c0_22 = arith.constant 0 : index
      %c0_23 = arith.constant 0 : index
      %c0_24 = arith.constant 0 : index
      %25 = vector.load %arg7[%c0_22, %c0_23, %c0_24] : memref<1x1x128xf32, #tpu.memory_space<vmem>>, vector<1x1x128xf32>
      %26 = vector.shape_cast %25 : vector<1x1x128xf32> to vector<1x128xf32>
      %27 = vector.shape_cast %24 : vector<1x128xf32> to vector<1x1x128xf32>
      tpu.vector_store %arg7[%c0_22, %c0_23, %c0_24], %27 {strides = array<i32>} : memref<1x1x128xf32, #tpu.memory_space<vmem>>, vector<1x1x128xf32>,
    } else {
    }
    return
  }
  func.func @transform_0(%arg0: i32, %arg1: i32) -> (i32, i32, i32) {
    %c0_i32 = arith.constant 0 : i32
    %c0_i32_0 = arith.constant 0 : i32
    return %arg0, %arg1, %c0_i32 : i32, i32, i32
  }
  func.func @transform_1(%arg0: i32, %arg1: i32) -> (i32, i32) {
    %c0_i32 = arith.constant 0 : i32
    %c0_i32_0 = arith.constant 0 : i32
    %c0_i32_1 = arith.constant 0 : i32
    return %c0_i32, %c0_i32_0 : i32, i32
  }
  func.func @transform_2(%arg0: i32, %arg1: i32) -> (i32, i32) {
    %c0_i32 = arith.constant 0 : i32
    %c0_i32_0 = arith.constant 0 : i32
    %c0_i32_1 = arith.constant 0 : i32
    return %c0_i32, %c0_i32_0 : i32, i32
  }
  func.func @transform_3(%arg0: i32, %arg1: i32) -> (i32, i32) {
    %c0_i32 = arith.constant 0 : i32
    %c0_i32_0 = arith.constant 0 : i32
    %c0_i32_1 = arith.constant 0 : i32
    return %c0_i32, %c0_i32_0 : i32, i32
  }
  func.func @transform_4(%arg0: i32, %arg1: i32) -> (i32, i32) {
    %c0_i32 = arith.constant 0 : i32
    %c0_i32_0 = arith.constant 0 : i32
    %c0_i32_1 = arith.constant 0 : i32
    return %c0_i32, %c0_i32_0 : i32, i32
  }
  func.func @transform_5(%arg0: i32, %arg1: i32) -> (i32, i32, i32) {
    %c0_i32 = arith.constant 0 : i32
    %c0_i32_0 = arith.constant 0 : i32
    %c0_i32_1 = arith.constant 0 : i32
    return %arg0, %c0_i32, %c0_i32_0 : i32, i32, i32
  }
}

</mosaic_0001>

<bundles_post_ra>
// kernel: tpu_custom_call.1
= control target key start
LH: loop header
LB: loop body
LE: loop exit
PB: predicated region body
PF: predicated region fallthrough
CT: control target
= control target key end

     0   :  { %10 = vsyncpa [#allocation4], 0  ;;  %s1028_s0 = inlined_call_operand.vmem [shape: bf16[2,8,256], index: 0, kind: input, shape index: {}]   ;;  %s1029_s1 = inlined_call_operand.vmem [shape: bf16[256,32], index: 1, kind: input, shape index: {}]   ;;  %s1030_s2 = inlined_call_operand.vmem [shape: f32[1,32], index: 2, kind: input, shape index: {}]   ;;  %s1031_s3 = inlined_call_operand.vmem [shape: bf16[32,128], index: 3, kind: input, shape index: {}]   ;;  %s1032_s4 = inlined_call_operand.vmem [shape: f32[1,128], index: 4, kind: input, shape index: {}]   ;;  %s1033_s5 = inlined_call_operand.hbm [shape: f32[2,1,128], index: 5, kind: output, shape index: {}]  }
   0x1   :  { %12 = vsyncpa [#allocation4 + $0x1], 0  ;;  %s852_s18 = smov 0   ;;  %s854_s19 = smov 0  }
   0x2   :  { %s856_s20 = smov 0   ;;  %s858_s21 = smov 0  }
   0x3   :  { %s860_s22 = smov 0   ;;  %s862_s23 = smov 0  }
   0x4 LB: > { %s597_s24 = sadd.s32 4294967295, %s817_s23   ;;  %s598_s25 = sadd.s32 4294967294, %s817_s23   ;;  %s817_s23 = sphi %s862_s23, %s18_s23   ;;  %s813_s22 = sphi %s860_s22, %s1040_s22   ;;  %s809_s21 = sphi %s858_s21, %s1039_s21   ;;  %s805_s20 = sphi %s856_s20, %s1038_s20   ;;  %s801_s19 = sphi %s854_s19, %s1037_s19   ;;  %s797_s18 = sphi %s852_s18, %s1036_s18  }
   0x5   : > { %s30_s26 = sadd.s32 1, %s813_s22  ;;  %s149_s27 = sadd.s32 1, %s805_s20 }
   0x6   : > { %p32_p0 = scmp.ge.s32.totalorder %s30_s26, 2  ;;  %p159_p1 = scmp.ne.s32.totalorder %s805_s20, %s801_s19 }
   0x7   : > { %p160_p2 = scmp.eq.s32.totalorder %s597_s24, 1  ;;  %p165_p3 = scmp.ne.s32.totalorder %s801_s19, %s797_s18 }
   0x8   : > { %s1042_s26 = smov (%p32_p0, %s30_s26), 0  ;;  %p166_p5 = scmp.eq.s32.totalorder %s598_s25, 1 }
   0x9   : > { %p892_p4 = por %p160_p2, %p159_p1  ;;  %s146_s29 = ssub.s32 %s813_s22, %s1042_s26 }
   0xa   : > { %p601_p6 = scmp.ge.s32.totalorder %s817_s23, 1  ;;  %p147_p7 = scmp.eq.s32.totalorder %s146_s29, 0 }
   0xb   : > { %p899_p8 = por %p166_p5, %p165_p3  ;;  %p208_p9 = scmp.lt.s32.totalorder %s817_s23, 3 }
   0xc   : > { %s905_s6 = scalar_select %p147_p7, %s805_s20, %s149_s27  }
   0xd   : > { %p209_p10 = pnand %p601_p6, %p208_p9 }
   0xe   : > { %v719_v0 = vld [vmem:[%s1029_s1 + $0x40] sm:$0xff] (!%p209_p10)   ;;  %v721_v2 = vld [vmem:[%s1029_s1 + $0x48] sm:$0xff] (!%p209_p10)   ;;  %p239_p11 = scmp.lt.s32.totalorder (!%p209_p10), %s809_s21, 1  ;;  %v723_v4 = vld [vmem:[%s1029_s1 + $0x50] sm:$0xff] (!%p209_p10)   ;;  %vm253_vm0 = vcmask (!%p209_p10), 253952   ;;  %v819_v19 = vmov (!%p209_p10), 0.0  }
   0xf   : > { %212 = sbr.rel (%p209_p10) target bundleno = 519 (0x207), region = 40  ;;  %v720_v1 = vld [vmem:[%s1029_s1] sm:$0xff] (!%p209_p10)   ;;  %629 = vmatprep.subr.bf16.mxu0 (!%p209_p10), %v719_v0  ;;  %v722_v3 = vld [vmem:[%s1029_s1 + $0x8] sm:$0xff] (!%p209_p10)   ;;  %v724_v5 = vld [vmem:[%s1029_s1 + $0x10] sm:$0xff] (!%p209_p10)   ;;  %254 = vst.msk [vmem:[#allocation2] sm:$0x1] (!%p209_p10), %vm253_vm0, %v819_v19  ;;  %654 = vmatprep.subr.bf16.mxu1 (!%p209_p10), %v819_v19 }
  0x10   : > { %630 = vmatpush3.bf16.msra.mxu0 (!%p209_p10), %v720_v1  ;;  %v725_v6 = vld [vmem:[%s1029_s1 + $0x58] sm:$0xff] (!%p209_p10)   ;;  %v727_v8 = vld [vmem:[%s1029_s1 + $0x60] sm:$0xff] (!%p209_p10)   ;;  %v729_v10 = vld [vmem:[%s1029_s1 + $0x68] sm:$0xff] (!%p209_p10)   ;;  %vm820_vm1 = vmmov (!%p209_p10), 0   ;;  %vm432_vm2 = vcmask (!%p209_p10), 261120   ;;  %s237_s27 = sand.u32 (!%p209_p10), 1, %s801_s19  }
  0x11   : > { %631 = vmatprep.subr.bf16.mxu0 (!%p209_p10), %v721_v2  ;;  %v726_v7 = vld [vmem:[%s1029_s1 + $0x18] sm:$0xff] (!%p209_p10)   ;;  %v728_v9 = vld [vmem:[%s1029_s1 + $0x20] sm:$0xff] (!%p209_p10)   ;;  %v730_v13 = vld [vmem:[%s1029_s1 + $0x28] sm:$0xff] (!%p209_p10)   ;;  %658 = vmatprep.mubr.msk.bf16.mxu1 (!%p209_p10), %vm820_vm1, %v819_v19  ;;  %s625_s8 = sshll.u32 (!%p209_p10), %s809_s21, 4  ;;  %s238_s9 = scalar_lea.vmem (!%p209_p10), [#allocation3], %s237_s27 }
  0x12   : > { %v731_v14 = vld [vmem:[%s1029_s1 + $0x70] sm:$0xff] (!%p209_p10)   ;;  %v733_v16 = vld [vmem:[%s1029_s1 + $0x78] sm:$0xff] (!%p209_p10)   ;;  %v737_v20 = vld [vmem:[%s1031_s3] sm:$0xff] (!%p209_p10)   ;;  %s525_s10 = sshll.u32 (!%p209_p10), %s238_s9, 4  ;;  %s981_s13 = scalar_lea.hbm (!%p209_p10), %s1033_s5, %s625_s8  ;;  %s983_s10 = int_to_ptr.vmem [resolvable:$true] %s525_s10 }
  0x13   : > { %v732_v15 = vld [vmem:[%s1029_s1 + $0x30] sm:$0xff] (!%p209_p10)   ;;  %v734_v17 = vld [vmem:[%s1029_s1 + $0x38] sm:$0xff] (!%p209_p10)   ;;  %655 = vmatpush3.bf16.msra.mxu1 (!%p209_p10), %v737_v20  ;;  %v738_v21 = vld [vmem:[%s1031_s3 + $0x8] sm:$0xff] (!%p209_p10)   ;;  %s821_s15 = smov (!%p209_p10), [#allocation3]  }
  0x14   : > { %632 = vmatpush3.bf16.msra.mxu0 (!%p209_p10), %v722_v3  ;;  %656 = vmatprep.subr.bf16.mxu1 (!%p209_p10), %v819_v19  ;;  %v448_v37 = vld [vmem:[%s1030_s2] sm:$0x1] (!%p209_p10)  ;;  %s743_s16 = sshll.u32 (!%p209_p10), %s821_s15, 4  ;;  %s744_s16 = int_to_ptr.vmem [resolvable:$false] %s743_s16 }
  0x15   : > { %633 = vmatprep.subr.bf16.mxu0 (!%p209_p10), %v723_v4  ;;  %v455_v41 = vld [vmem:[%s1032_s4] sm:$0x1] (!%p209_p10)  ;;  %p746_p1 = scmp.lt.s32.totalorder (!%p209_p10), %s983_s10, %s744_s16 }
  0x16   : > { %s240_s17 = scalar_select %p239_p11, %s809_s21, 1  ;;  %v431_v33 = vld [vmem:[#allocation2] sm:$0x1] }
  0x17   : > { %657 = vmatpush3.bf16.msra.mxu1 %v738_v21  ;;  %s739_s21 = scalar_lea.vmem %s983_s10, 16 }
  0x18   : > { %s628_s7 = sshll.u32 %s240_s17, 3  ;;  %634 = vmatpush3.bf16.msra.mxu0 %v724_v5  ;;  %p740_p12 = scmp.ne.s32.totalorder %s983_s10, %s739_s21 }
  0x19   : > { %635 = vmatprep.subr.bf16.mxu0 %v725_v6  ;;  %s247_s14 = scalar_lea.vmem %s1028_s0, %s628_s7  ;;  %s745_s17 = scalar_lea.vmem %s744_s16, 32 }
  0x1a   : > { %v255_v11 = vld [vmem:[%s247_s14] sm:$0xff]  ;;  %s513_s14 = scalar_lea.sflag [#allocation4], %s237_s27  ;;  %p741_p13 = pnand %p740_p12, %p892_p4 }
  0x1b   : > { %v605_v12 = vcombine.high %v255_v11, %v255_v11  ;;  %v604_v18 = vcombine.low %v255_v11, %v255_v11  ;;  %p747_p2 = scmp.lt.s32.totalorder %s745_s17, %s739_s21 }
  0x1c   : > { %636 = vmatpush3.bf16.msra.mxu0 %v726_v7  ;;  %p742_p0 = pneg %p741_p13 }
  0x1d   : > { %637 = vmatprep.subr.bf16.mxu0 %v727_v8  ;;  %423 = vmatprep.mubr.bf16.mxu0 %v605_v12  ;;  %p748_p3 = por %p747_p2, %p746_p1 }
  0x1f   : > { %p749_p5 = pnand %p748_p3, %p742_p0 }
  0x20   : > { %638 = vmatpush3.bf16.msra.mxu0 %v728_v9 }
  0x21   : > { %639 = vmatprep.subr.bf16.mxu0 %v729_v10 }
  0x24   : > { %640 = vmatpush3.bf16.msra.mxu0 %v730_v13 }
  0x25   : > { %641 = vmatprep.subr.bf16.mxu0 %v731_v14 }
  0x28   : > { %642 = vmatpush3.bf16.msra.mxu0 %v732_v15 }
  0x29   : > { %643 = vmatprep.subr.bf16.mxu0 %v733_v16 }
  0x2c   : > { %644 = vmatpush3.bf16.msra.mxu0 %v734_v17 }
  0x2f   : > { %424 = vmatmul.mubr.bf16.vlgmr.msra.gmra.mrb[0].mxu0 %v604_v18 }
 0x102   : > { %v645_v22 = vpop.f32.mrb[0].mxu0 }
 0x103   : > { %v646_v23 = vpop.f32.mrb[1].mxu0 }
 0x104   : > { %v647_v24 = vadd.f32 %v646_v23, %v645_v22  ;;  %v648_v25 = vpop.f32.mrb[2].mxu0 }
 0x105   : > { %v649_v26 = vpop.f32.mrb[3].mxu0 }
 0x106   : > { %v433_v27 = vsel %vm432_vm2, %v647_v24, 0.0 }
 0x107   : > { %v434_v28 = vrot.slane %v433_v27, 4 }
 0x109   : > { %v435_v29 = vadd.f32 %v434_v28, %v433_v27 }
 0x10b   : > { %v436_v30 = vrot.slane %v435_v29, 2 }
 0x10d   : > { %v437_v31 = vadd.f32 %v436_v30, %v435_v29 }
 0x10f   : > { %v438_v32 = vrot.slane %v437_v31, 1 }
 0x111   : > { %v439_v34 = vadd.f32 %v438_v32, %v437_v31 }
 0x113   : > { %v440_v35 = vadd.f32 %v439_v34, %v431_v33 }
 0x115   : > { %442 = vst.msk [vmem:[#allocation2] sm:$0x1] %vm253_vm0, %v440_v35 }
 0x11c   : > { %v446_v36 = vld [vmem:[#allocation2] sm:$0x1] }
 0x11d   : > { %v447_v38 = vmul.f32 0.25, %v446_v36 }
 0x11f   : > { %v449_v39 = vadd.f32 %v448_v37, %v447_v38 }
 0x121   : > { %v450_v40 = vpack.c.bf16 %v449_v39, %v449_v39 }
 0x123   : > { %659 = vmatmul.mubr.msk.bf16.vlgmr.msra.gmra.mrb[0].mxu1 %vm432_vm2, %v450_v40 }
 0x1f6   : > { %v505_v42 = vpop.f32.mrb[0].mxu1 }
 0x1f7   : > { %v506_v43 = vadd.f32 %v505_v42, %v455_v41  ;;  %v660_v44 = vpop.f32.mrb[1].mxu1 }
 0x1f8   : > { %v508_v45 = vpop.f32.mrb[2].mxu1 }
 0x1f9   : > { %511 = vst [vmem:[%s238_s9] sm:$0x1] %v506_v43  ;;  %v661_v46 = vpop.f32.mrb[3].mxu1 }
 0x1fa   : > { %752 = shalt.err (!%p749_p5)
}
 0x1fb   : > { %s753_s24 = scalar_lea.hbm %s981_s13, 16  ;;  %s757_s29 = scalar_lea.hbm %s1033_s5, 32 }
 0x1fc   : > { %p754_p6 = scmp.ne.s32.totalorder %s981_s13, %s753_s24  ;;  %p758_p10 = scmp.lt.u32.totalorder %s981_s13, %s1033_s5 }
 0x1fd   : > { %p759_p11 = scmp.lt.u32.totalorder %s757_s29, %s753_s24  ;;  %p761_p13 = scmp.lt.u32.totalorder %s753_s24, %s981_s13 }
 0x1fe   : > { %p755_p7 = pnand %p754_p6, %p892_p4 }
 0x1ff   : > { %p760_p12 = por %p759_p11, %p758_p10 }
 0x200   : > { %p756_p9 = pneg %p755_p7 }
 0x201   : > { %p762_p0 = por %p761_p13, %p760_p12 }
 0x203   : > { %p763_p1 = pnand %p762_p0, %p756_p9 }
 0x205   : > { %766 = shalt.err (!%p763_p1)
}
 0x206   : > { %662 = dma.vmem_to_hbm [thread:$0]  (%p892_p4), %s983_s10, 16, %s981_s13, %s513_s14  }
 0x207 PF: > { %p668_p2 = scmp.ge.s32.totalorder %s817_s23, 2  ;;  %s537_s9 = sand.u32 1, %s797_s18  }
 0x208   : > { %s538_s11 = scalar_lea.sflag [#allocation4], %s537_s9 }
 0x209   : > { %p665_p3 = pnand %p668_p2, %p899_p8 }
 0x20b   : > { %792 = dma.done.wait (!%p665_p3), %s538_s11, 16  }
 0x20c   : > { %794 = vsyncadd (!%p665_p3), %s538_s11, 4294967280  ;;  %s18_s23 = sadd.s32 1, %s817_s23   ;;  %s1036_s18 = smov %s801_s19 }
 0x20d   : > { %p15_p5 = scmp.ge.s32.totalorder %s18_s23, 4   ;;  %s1037_s19 = smov %s805_s20 }
 0x20e   : > { %s1038_s20 = smov %s905_s6  ;;  %s1039_s21 = smov %s813_s22 }
 0x20f   : > { %s1040_s22 = smov %s1042_s26  ;;  %17 = sbr.rel (!%p15_p5) target bundleno = 4 (0x4), region = 83 }
 0x216   :  { %542 = vsyncpa [#allocation4], 1 }
 0x217   :  { %544 = vsyncpa [#allocation4 + $0x1], 1 }

</bundles_post_ra>
